<compile_context>
chip_gen: v7x
topology: tpu7x:2x2x1
jax: 0.10.0
libtpu: 0.0.40
codegen_flags: <defaults>
</compile_context>

<pallas_src>
import functools
import math

import jax
import jax.numpy as jnp
from jax import lax
from jax.experimental import pallas as pl
from jax.experimental.pallas import tpu as pltpu

LANE = 128
SUBLANE = 8
CHUNK = 64  # rows per inner-loop step: keeps live vregs far below the 64-vreg file


def _vmem_limit_bytes():
    """Generation-aware scoped-VMEM budget (~3/4 of physical, capped)."""
    try:
        phys = int(pltpu.get_tpu_info().vmem_capacity_bytes)
    except Exception:
        phys = 64 * 1024 * 1024  # conservative: v7x per-TensorCore VMEM
    return min((phys * 3) // 4, 112 * 1024 * 1024)  # v7x ~48 MiB, v5e/v6e ~96 MiB


def _choose_tile_rows(R, M, pred_itemsize, targ_itemsize, vmem_limit, max_tile_rows):
    """Row-tile height: multiple of 8 (or the full R), sized from the VMEM budget."""
    # Double-buffered input bytes per 128-lane row: M logit rows + 1 target row.
    per_row = 2 * LANE * (M * pred_itemsize + targ_itemsize)
    budget = (vmem_limit * 17) // 20  # ~85%: headroom for outputs / internal scratch
    tr = max(SUBLANE, (budget // per_row) // SUBLANE * SUBLANE)
    if max_tile_rows is not None:  # test/override hook
        tr = min(tr, max(SUBLANE, (max_tile_rows // SUBLANE) * SUBLANE))
    if tr < R:
        return tr, pl.cdiv(R, tr)
    # Everything fits in one tile.  If the data is still big, split in two so the
    # "parallel" r axis can be sharded across v7x's two TensorCores.
    half = pl.cdiv(pl.cdiv(R, 2), SUBLANE) * SUBLANE
    min_split_rows = pl.cdiv(4 * 1024 * 1024, M * LANE * pred_itemsize)  # >=4MiB logits/tile
    if max_tile_rows is None and half >= min_split_rows:
        return half, pl.cdiv(R, half)
    return R, 1  # single full-extent block (legal even when R % 8 != 0)


def _make_bce_blend_kernel(M, tile_rows, n_elem, need_mask):
    full_rows = n_elem // LANE   # fully valid 128-wide rows
    rem_lanes = n_elem % LANE    # valid lanes in row `full_rows` (0 => lane-aligned)
    n_full = tile_rows // CHUNK
    rem_rows = tile_rows % CHUNK

    def _mask(row0, nrows):
        if not need_mask:
            return None
        rows = row0 + lax.broadcasted_iota(jnp.int32, (nrows, LANE), 0)
        m = rows < full_rows
        if rem_lanes:
            lanes = lax.broadcasted_iota(jnp.int32, (nrows, LANE), 1)
            m = m | ((rows == full_rows) & (lanes < rem_lanes))
        return m

    def _fold_rows(per):
        rows = per.shape[0]
        if rows % SUBLANE == 0:
            # Sublane-group fold: pure VALU adds, no cross-lane (XLU) reduce.
            return per.reshape(rows // SUBLANE, SUBLANE, LANE).sum(axis=0)
        # Ragged (tiny, single-tile-only) tail: fold all rows into sublane 0.
        col = per.sum(axis=0, keepdims=True)                        # (1, 128)
        row0 = lax.broadcasted_iota(jnp.int32, (SUBLANE, LANE), 0) == 0
        return jnp.where(row0, col, 0.0)

    def _accum(acc, x, y, w, mask):
        # Numerically stable BCE-with-logits (== torch.nn.BCEWithLogitsLoss):
        #   l = max(x, 0) - x*y + log1p(exp(-|x|))
        per = jnp.maximum(x, 0.0) - x * y + jnp.log1p(jnp.exp(-jnp.abs(x)))
        if mask is not None:
            per = jnp.where(mask, per, 0.0)  # garbage / pad rows contribute 0
        return acc + _fold_rows(per) * w

    def kernel(w_ref, pred_ref, targ_ref, out_ref):
        """Grid = (num_r,).

        w_ref    : SMEM (M,)                 -- weight[m] * scale / n_elem
        pred_ref : VMEM (M, tile_rows, 128)  -- all models' logits, row-tile r
        targ_ref : VMEM (tile_rows, 128)     -- targets, row-tile r
        out_ref  : VMEM (1, 8, 128)          -- per-row-tile partial-sum slab
        """
        tile_row0 = pl.program_id(0) * tile_rows

        def process(start, nrows, acc):
            # Target loaded/cast once per chunk, shared across all M models.
            y = targ_ref[pl.ds(start, nrows), :].astype(jnp.float32)
            mask = _mask(tile_row0 + start, nrows)
            for mi in range(M):  # M is tiny (e.g. 3): static unroll
                x = pred_ref[mi, pl.ds(start, nrows), :].astype(jnp.float32)
                # TODO(synk): with bf16 inputs on v6e/v7x the elementwise math
                # could stay in bf16 (f32 accumulation only); kept f32 here for
                # v5e compatibility and exact parity with the reference.
                acc = _accum(acc, x, y, w_ref[mi], mask)
            return acc

        acc = jnp.zeros((SUBLANE, LANE), jnp.float32)
        if n_full:
            def body(c, a):
                return process(pl.multiple_of(c * CHUNK, CHUNK), CHUNK, a)
            acc = lax.fori_loop(0, n_full, body, acc)
        if rem_rows:
            acc = process(n_full * CHUNK, rem_rows, acc)
        out_ref[0] = acc

    return kernel


@functools.partial(jax.jit, static_argnames=("scale", "max_tile_rows"))
def sum_gradient_blending(preds, targ, weights, scale=1.0, max_tile_rows=None):
    """preds: (M, B, C, H, W) logits (xb stacked); targ: (B, C, H, W) in [0, 1];
    weights: (M,) per-model weights; scale: python float.

    Returns scalar: sum_m  BCEWithLogits_mean(preds[m], targ) * scale * weights[m]
    """
    M = preds.shape[0]
    n_elem = math.prod(preds.shape[1:])

    preds_flat = preds.reshape(M, n_elem)  # native dtype, no host upcast
    targ_flat = targ.reshape(n_elem)

    # Only pad (with zeros -- the in-kernel mask ignores them) when n_elem is not
    # a multiple of the 128-lane width; otherwise the reshape below is zero-copy.
    lane_pad = (-n_elem) % LANE
    if lane_pad:
        # TODO(synk): this rare path still materializes one padded copy of the
        # logits in HBM; a split body/tail scheme could avoid it for huge inputs.
        preds_flat = jnp.pad(preds_flat, ((0, 0), (0, lane_pad)))
        targ_flat = jnp.pad(targ_flat, ((0, lane_pad),))

    R = (n_elem + lane_pad) // LANE
    vmem_limit = _vmem_limit_bytes()
    tile_rows, num_r = _choose_tile_rows(
        R, M,
        jnp.dtype(preds.dtype).itemsize, jnp.dtype(targ.dtype).itemsize,
        vmem_limit, max_tile_rows)
    need_mask = (lane_pad != 0) or (num_r * tile_rows != R)

    preds3 = preds_flat.reshape(M, R, LANE)
    targ2 = targ_flat.reshape(R, LANE)

    # Fold scale, per-model weight and the 1/N of the mean into one vector; the
    # kernel then only accumulates weighted raw partial sums.
    w_scaled = (jnp.asarray(weights, jnp.float32).reshape(M)
                * jnp.float32(scale / n_elem))

    partials = pl.pallas_call(
        _make_bce_blend_kernel(M, tile_rows, n_elem, need_mask),
        out_shape=jax.ShapeDtypeStruct((num_r, SUBLANE, LANE), jnp.float32),
        grid_spec=pl.GridSpec(
            grid=(num_r,),
            in_specs=[
                pl.BlockSpec(memory_space=pltpu.SMEM),                     # weights
                pl.BlockSpec((M, tile_rows, LANE), lambda r: (0, r, 0)),   # logits tile (all M)
                pl.BlockSpec((tile_rows, LANE), lambda r: (r, 0)),         # target tile
            ],
            out_specs=pl.BlockSpec((1, SUBLANE, LANE), lambda r: (r, 0, 0)),
        ),
        compiler_params=pltpu.CompilerParams(
            dimension_semantics=("parallel",),   # independent row-tiles -> megacore split
            vmem_limit_bytes=int(vmem_limit),
        ),
    )(w_scaled, preds3, targ2)

    # Tiny final reduction (num_r * 1024 floats) in plain JAX.
    return jnp.sum(partials)


def _reference(preds, targ, weights, scale):
    # Pure-JAX reference mirroring the PyTorch module.
    loss = jnp.float32(0.0)
    for m in range(preds.shape[0]):
        x = preds[m].astype(jnp.float32)
        y = targ.astype(jnp.float32)
        l = jnp.maximum(x, 0.0) - x * y + jnp.log1p(jnp.exp(-jnp.abs(x)))
        loss = loss + jnp.mean(l) * scale * weights[m]
    return loss


if __name__ == "__main__":
    key = jax.random.PRNGKey(0)

    M = 3  # number of models being blended (len(self.weights))
    weights = jnp.array([0.3, 0.5, 0.2], dtype=jnp.float32)

    # (per-model NCHW shape, forced max_tile_rows for path coverage, loss_scale)
    cases = [
        ((2, 4, 16, 16), None, 1.0),   # lane-aligned, single full-extent tile
        ((2, 4, 16, 16), 8, 1.0),      # forced tiny tiles: multi-step grid path
        ((2, 8, 32, 32), None, 0.5),   # large enough to hit the chunked fori_loop path
        ((2, 8, 32, 32), 72, 1.0),     # multi-tile + tail chunk + row masking
        ((2, 3, 15, 17), None, 1.0),   # ragged element count: lane masking
        ((2, 3, 15, 17), 8, 1.0),      # ragged + multi-tile: row + lane masking
    ]

    ok = True
    for shape, mtr, scale in cases:
        k1, k2, key = jax.random.split(key, 3)
        preds = jax.random.normal(k1, (M,) + shape, dtype=jnp.float32)
        # Binary targets in {0, 1} as BCEWithLogitsLoss expects.
        targ = (jax.random.uniform(k2, shape) > 0.5).astype(jnp.float32)

        loss = sum_gradient_blending(preds, targ, weights, scale, max_tile_rows=mtr)
        jax.block_until_ready(loss)
        ref = _reference(preds, targ, weights, scale)
        if not jnp.allclose(loss, ref, rtol=1e-4, atol=1e-5):
            ok = False
            print("MISMATCH", shape, mtr, float(loss), float(ref))

    # TODO(synk): `set_grad` (loss.requires_grad = True) has no JAX meaning; omitted.
    if ok:
        print("KERNEL_OK")
</pallas_src>

<mosaic_0001>
module attributes {stable_mosaic.version = 11 : i64} {
  func.func @kernel(%arg0: i32, %arg1: memref<3xf32, #tpu.memory_space<smem>>, %arg2: memref<3x16x128xf32, #tpu.memory_space<vmem>>, %arg3: memref<16x128xf32, #tpu.memory_space<vmem>>, %arg4: memref<1x8x128xf32, #tpu.memory_space<vmem>>) attributes {dimension_semantics = [#tpu.dimension_semantics<parallel>], iteration_bounds = array<i64: 1>, scalar_prefetch = 0 : i64, scratch_operands = 0 : i64, tpu.core_type = #tpu.core_type<tc>, window_params = [{transform_indices = @transform_0, window_bounds = array<i64: 3>}, {transform_indices = @transform_1, window_bounds = array<i64: 3, 16, 128>}, {transform_indices = @transform_2, window_bounds = array<i64: 16, 128>}, {transform_indices = @transform_3, window_bounds = array<i64: 1, 8, 128>}]} {
    %cst = arith.constant 0.000000e+00 : f32
    %0 = vector.broadcast %cst : f32 to vector<8x128xf32>
    %c0 = arith.constant 0 : index
    %c0_0 = arith.constant 0 : index
    %1 = vector.load %arg3[%c0, %c0_0] : memref<16x128xf32, #tpu.memory_space<vmem>>, vector<16x128xf32>
    %c0_1 = arith.constant 0 : index
    %c0_2 = arith.constant 0 : index
    %c0_3 = arith.constant 0 : index
    %2 = vector.load %arg2[%c0_1, %c0_2, %c0_3] : memref<3x16x128xf32, #tpu.memory_space<vmem>>, vector<1x16x128xf32>
    %3 = vector.shape_cast %2 : vector<1x16x128xf32> to vector<16x128xf32>
    %c0_4 = arith.constant 0 : index
    %4 = memref.load %arg1[%c0_4] : memref<3xf32, #tpu.memory_space<smem>>
    %cst_5 = arith.constant 0.000000e+00 : f32
    %5 = vector.broadcast %cst_5 : f32 to vector<16x128xf32>
    %6 = arith.maximumf %3, %5 : vector<16x128xf32>
    %7 = arith.mulf %3, %1 : vector<16x128xf32>
    %8 = arith.subf %6, %7 : vector<16x128xf32>
    %9 = math.absf %3 : vector<16x128xf32>
    %cst_6 = arith.constant 0.000000e+00 : f32
    %10 = vector.broadcast %cst_6 : f32 to vector<16x128xf32>
    %11 = arith.subf %10, %9 : vector<16x128xf32>
    %12 = math.exp %11 : vector<16x128xf32>
    %13 = math.log1p %12 : vector<16x128xf32>
    %14 = arith.addf %8, %13 : vector<16x128xf32>
    %15 = vector.shape_cast %14 : vector<16x128xf32> to vector<2x8x128xf32>
    %cst_7 = arith.constant dense<0.000000e+00> : vector<8x128xf32>
    %16 = vector.multi_reduction <add>, %15, %cst_7 [0] : vector<2x8x128xf32> to vector<8x128xf32>
    %17 = vector.broadcast %4 : f32 to vector<8x128xf32>
    %18 = arith.mulf %16, %17 : vector<8x128xf32>
    %19 = arith.addf %0, %18 : vector<8x128xf32>
    %c1 = arith.constant 1 : index
    %c0_8 = arith.constant 0 : index
    %c0_9 = arith.constant 0 : index
    %20 = vector.load %arg2[%c1, %c0_8, %c0_9] : memref<3x16x128xf32, #tpu.memory_space<vmem>>, vector<1x16x128xf32>
    %21 = vector.shape_cast %20 : vector<1x16x128xf32> to vector<16x128xf32>
    %c1_10 = arith.constant 1 : index
    %22 = memref.load %arg1[%c1_10] : memref<3xf32, #tpu.memory_space<smem>>
    %cst_11 = arith.constant 0.000000e+00 : f32
    %23 = vector.broadcast %cst_11 : f32 to vector<16x128xf32>
    %24 = arith.maximumf %21, %23 : vector<16x128xf32>
    %25 = arith.mulf %21, %1 : vector<16x128xf32>
    %26 = arith.subf %24, %25 : vector<16x128xf32>
    %27 = math.absf %21 : vector<16x128xf32>
    %cst_12 = arith.constant 0.000000e+00 : f32
    %28 = vector.broadcast %cst_12 : f32 to vector<16x128xf32>
    %29 = arith.subf %28, %27 : vector<16x128xf32>
    %30 = math.exp %29 : vector<16x128xf32>
    %31 = math.log1p %30 : vector<16x128xf32>
    %32 = arith.addf %26, %31 : vector<16x128xf32>
    %33 = vector.shape_cast %32 : vector<16x128xf32> to vector<2x8x128xf32>
    %cst_13 = arith.constant dense<0.000000e+00> : vector<8x128xf32>
    %34 = vector.multi_reduction <add>, %33, %cst_13 [0] : vector<2x8x128xf32> to vector<8x128xf32>
    %35 = vector.broadcast %22 : f32 to vector<8x128xf32>
    %36 = arith.mulf %34, %35 : vector<8x128xf32>
    %37 = arith.addf %19, %36 : vector<8x128xf32>
    %c2 = arith.constant 2 : index
    %c0_14 = arith.constant 0 : index
    %c0_15 = arith.constant 0 : index
    %38 = vector.load %arg2[%c2, %c0_14, %c0_15] : memref<3x16x128xf32, #tpu.memory_space<vmem>>, vector<1x16x128xf32>
    %39 = vector.shape_cast %38 : vector<1x16x128xf32> to vector<16x128xf32>
    %c2_16 = arith.constant 2 : index
    %40 = memref.load %arg1[%c2_16] : memref<3xf32, #tpu.memory_space<smem>>
    %cst_17 = arith.constant 0.000000e+00 : f32
    %41 = vector.broadcast %cst_17 : f32 to vector<16x128xf32>
    %42 = arith.maximumf %39, %41 : vector<16x128xf32>
    %43 = arith.mulf %39, %1 : vector<16x128xf32>
    %44 = arith.subf %42, %43 : vector<16x128xf32>
    %45 = math.absf %39 : vector<16x128xf32>
    %cst_18 = arith.constant 0.000000e+00 : f32
    %46 = vector.broadcast %cst_18 : f32 to vector<16x128xf32>
    %47 = arith.subf %46, %45 : vector<16x128xf32>
    %48 = math.exp %47 : vector<16x128xf32>
    %49 = math.log1p %48 : vector<16x128xf32>
    %50 = arith.addf %44, %49 : vector<16x128xf32>
    %51 = vector.shape_cast %50 : vector<16x128xf32> to vector<2x8x128xf32>
    %cst_19 = arith.constant dense<0.000000e+00> : vector<8x128xf32>
    %52 = vector.multi_reduction <add>, %51, %cst_19 [0] : vector<2x8x128xf32> to vector<8x128xf32>
    %53 = vector.broadcast %40 : f32 to vector<8x128xf32>
    %54 = arith.mulf %52, %53 : vector<8x128xf32>
    %55 = arith.addf %37, %54 : vector<8x128xf32>
    %c0_20 = arith.constant 0 : index
    %c0_21 = arith.constant 0 : index
    %c0_22 = arith.constant 0 : index
    %56 = vector.load %arg4[%c0_20, %c0_21, %c0_22] : memref<1x8x128xf32, #tpu.memory_space<vmem>>, vector<1x8x128xf32>
    %57 = vector.shape_cast %56 : vector<1x8x128xf32> to vector<8x128xf32>
    %58 = vector.shape_cast %55 : vector<8x128xf32> to vector<1x8x128xf32>
    tpu.vector_store %arg4[%c0_20, %c0_21, %c0_22], %58 {strides = array<i32>} : memref<1x8x128xf32, #tpu.memory_space<vmem>>, vector<1x8x128xf32>,
    return
  }
  func.func @transform_0(%arg0: i32) -> i32 {
    %c0_i32 = arith.constant 0 : i32
    %c0_i32_0 = arith.constant 0 : i32
    return %c0_i32 : i32
  }
  func.func @transform_1(%arg0: i32) -> (i32, i32, i32) {
    %c0_i32 = arith.constant 0 : i32
    %c0_i32_0 = arith.constant 0 : i32
    %c0_i32_1 = arith.constant 0 : i32
    return %c0_i32, %arg0, %c0_i32_0 : i32, i32, i32
  }
  func.func @transform_2(%arg0: i32) -> (i32, i32) {
    %c0_i32 = arith.constant 0 : i32
    %c0_i32_0 = arith.constant 0 : i32
    return %arg0, %c0_i32 : i32, i32
  }
  func.func @transform_3(%arg0: i32) -> (i32, i32, i32) {
    %c0_i32 = arith.constant 0 : i32
    %c0_i32_0 = arith.constant 0 : i32
    %c0_i32_1 = arith.constant 0 : i32
    return %arg0, %c0_i32, %c0_i32_0 : i32, i32, i32
  }
}

</mosaic_0001>

<bundles_post_ra>
// kernel: sum_gradient_blending.1
= control target key start
LH: loop header
LB: loop body
LE: loop exit
PB: predicated region body
PF: predicated region fallthrough
CT: control target
= control target key end

     0   :  { %8 = vsyncpa [#allocation3], 0  ;;  %s317_s0 = inlined_call_operand.vmem [shape: f32[3], index: 0, kind: input, shape index: {}]   ;;  %s318_s1 = inlined_call_operand.vmem [shape: f32[3,16,128], index: 1, kind: input, shape index: {}]   ;;  %s319_s2 = inlined_call_operand.vmem [shape: f32[16,128], index: 2, kind: input, shape index: {}]   ;;  %s320_s3 = inlined_call_operand.vmem [shape: f32[1,8,128], index: 3, kind: output, shape index: {}]  }
   0x1   :  { %s15_s14 = sshll.u32 %s317_s0, 4  ;;  %s16_s14 = int_to_ptr.vmem [resolvable:$true] %s15_s14 }
   0x2   :  { %s191_s15 = scalar_lea.vmem %s16_s14, 16  ;;  %p196_p1 = scmp.lt.s32.totalorder %s16_s14, %s16_s14 }
   0x3   :  { %p192_p0 = scmp.ne.s32.totalorder %s16_s14, %s191_s15  ;;  %p197_p2 = scmp.lt.s32.totalorder %s191_s15, %s191_s15 }
   0x5   :  { %p198_p3 = por %p197_p2, %p196_p1 }
   0x7   :  { %p199_p4 = pnand %p198_p3, %p192_p0 }
   0x9   :  { %202 = shalt.err (!%p199_p4)
}
   0xa   :  { %s205_s16 = smov [#allocation2]  }
   0xb   :  { %18 = dma.vmem_to_smem %s16_s14, 16, %s205_s16, [#allocation3]  }
   0xc   :  { %203 = dma.done.wait [#allocation3], 16  }
   0xd   :  { %204 = vsyncadd [#allocation3], 4294967280 }
   0xe   :  { %26 = sfence }
   0xf   :  { %v29_v0 = vld [vmem:[%s318_s1] sm:$0xff]  ;;  %v30_v1 = vld [vmem:[%s318_s1 + $0x8] sm:$0xff]  ;;  %v238_v3 = vld [vmem:[%s318_s1 + $0x10] sm:$0xff]  ;;  %s283_s4 = sld [smem:[#allocation2 + $0x1]]  ;;  %s165_s5 = sld [smem:[#allocation2 + $0x2]] }
  0x10   :  { %v38_v2 = vand.u32 2147483647, %v29_v0  ;;  %v39_v4 = vand.u32 2147483647, %v30_v1  ;;  %v243_v5 = vld [vmem:[%s318_s1 + $0x18] sm:$0xff]  ;;  %v250_v13 = vld [vmem:[%s318_s1 + $0x20] sm:$0xff] }
  0x11   :  { %v80_v8 = vand.u32 2147483647, %v238_v3  ;;  %v81_v10 = vand.u32 2147483647, %v243_v5  ;;  %v255_v14 = vld [vmem:[%s318_s1 + $0x28] sm:$0xff]  ;;  %v27_v25 = vld [vmem:[%s319_s2] sm:$0xff] }
  0x12   :  { %v40_v6 = vsub.f32 0.0, %v38_v2  ;;  %v41_v7 = vsub.f32 0.0, %v39_v4  ;;  %v122_v18 = vand.u32 2147483647, %v250_v13  ;;  %v123_v19 = vand.u32 2147483647, %v255_v14 }
  0x13   :  { %v82_v12 = vsub.f32 0.0, %v80_v8  ;;  %v83_v15 = vsub.f32 0.0, %v81_v10  ;;  %v265_v27 = vld [vmem:[%s319_s2 + $0x8] sm:$0xff]  ;;  %v32_v31 = vmax.f32 %v29_v0, 0.0  ;;  %v33_v32 = vmax.f32 %v30_v1, 0.0  ;;  %s275_s2 = sld [smem:[#allocation2]] }
  0x14   :  { %v42_v9 = vmul.f32 1.442695, %v40_v6  ;;  %v44_v11 = vmul.f32 1.442695, %v41_v7  ;;  %v124_v20 = vsub.f32 0.0, %v122_v18  ;;  %v125_v21 = vsub.f32 0.0, %v123_v19 }
  0x15   :  { %v84_v16 = vmul.f32 1.442695, %v82_v12  ;;  %v86_v17 = vmul.f32 1.442695, %v83_v15  ;;  %v34_v33 = vmul.f32 %v29_v0, %v27_v25  ;;  %v35_v35 = vmul.f32 %v30_v1, %v265_v27 }
  0x16   :  { %167 = vpow2.f32 %v42_v9  ;;  %v126_v22 = vmul.f32 1.442695, %v124_v20  ;;  %v128_v23 = vmul.f32 1.442695, %v125_v21  ;;  %v74_v40 = vmax.f32 %v238_v3, 0.0 }
  0x17   :  { %169 = vpow2.f32 %v44_v11  ;;  %v76_v41 = vmul.f32 %v238_v3, %v27_v25  ;;  %v36_v42 = vsub.f32 %v32_v31, %v34_v33  ;;  %v37_v45 = vsub.f32 %v33_v32, %v35_v35 }
  0x18   :  { %171 = vpow2.f32 %v84_v16  ;;  %v75_v47 = vmax.f32 %v243_v5, 0.0  ;;  %v77_v52 = vmul.f32 %v243_v5, %v265_v27  ;;  %v116_v56 = vmax.f32 %v250_v13, 0.0 }
  0x19   :  { %173 = vpow2.f32 %v86_v17  ;;  %v78_v55 = vsub.f32 %v74_v40, %v76_v41  ;;  %v117_v8 = vmax.f32 %v255_v14, 0.0  ;;  %v118_v9 = vmul.f32 %v250_v13, %v27_v25 }
  0x1a   :  { %175 = vpow2.f32 %v126_v22  ;;  %v79_v3 = vsub.f32 %v75_v47, %v77_v52 }
  0x1b   :  { %177 = vpow2.f32 %v128_v23 }
  0x20   :  { %v168_v24 = vpop.eup %167 }
  0x21   :  { %v170_v26 = vpop.eup %169  ;;  %v46_v28 = vadd.f32 1.0, %v168_v24  ;;  %v49_v36 = vmul.f32 -0.5, %v168_v24  ;;  %v52_v50 = vand.u32 2147483647, %v168_v24 }
  0x22   :  { %v55_v29 = vadd.f32 1.0, %v170_v26  ;;  %v172_v30 = vpop.eup %171  ;;  %v58_v38 = vmul.f32 -0.5, %v170_v26  ;;  %v61_v54 = vand.u32 2147483647, %v170_v26 }
  0x23   :  { %179 = vlog2.f32 %v46_v28  ;;  %v174_v34 = vpop.eup %173  ;;  %v88_v37 = vadd.f32 1.0, %v172_v30  ;;  %v91_v43 = vmul.f32 -0.5, %v172_v30  ;;  %v50_v46 = vadd.f32 1.0, %v49_v36 }
  0x24   :  { %181 = vlog2.f32 %v55_v29  ;;  %v97_v39 = vadd.f32 1.0, %v174_v34  ;;  %v176_v44 = vpop.eup %175  ;;  %v100_v48 = vmul.f32 -0.5, %v174_v34  ;;  %v59_v51 = vadd.f32 1.0, %v58_v38 }
  0x25   :  { %183 = vlog2.f32 %v88_v37  ;;  %v271_v49 = vpop.eup %177  ;;  %v130_v53 = vadd.f32 1.0, %v176_v44  ;;  %v92_v58 = vadd.f32 1.0, %v91_v43  ;;  %v94_v59 = vand.u32 2147483647, %v172_v30 }
  0x26   :  { %185 = vlog2.f32 %v97_v39  ;;  %v139_v57 = vadd.f32 1.0, %v271_v49  ;;  %v103_v60 = vand.u32 2147483647, %v174_v34  ;;  %v51_v61 = vmul.f32 %v168_v24, %v50_v46 }
  0x27   :  { %187 = vlog2.f32 %v130_v53  ;;  %v101_v62 = vadd.f32 1.0, %v100_v48  ;;  %v133_v63 = vmul.f32 -0.5, %v176_v44  ;;  %vm279_vm0 = vcmp.lt.f32.partialorder %v52_v50, 0.0004427343 }
  0x28   :  { %189 = vlog2.f32 %v139_v57  ;;  %v60_v2 = vmul.f32 %v170_v26, %v59_v51  ;;  %v142_v4 = vmul.f32 -0.5, %v271_v49  ;;  %vm286_vm1 = vcmp.lt.f32.partialorder %v61_v54, 0.0004427343 }
  0x29   :  { %v93_v11 = vmul.f32 %v172_v30, %v92_v58  ;;  %vm292_vm2 = vcmp.lt.f32.partialorder %v94_v59, 0.0004427343  ;;  %vm296_vm3 = vcmp.lt.f32.partialorder %v103_v60, 0.0004427343  ;;  %v102_v18 = vmul.f32 %v174_v34, %v101_v62 }
  0x2a   :  { %v134_v19 = vadd.f32 1.0, %v133_v63  ;;  %v136_v20 = vand.u32 2147483647, %v176_v44  ;;  %v143_v24 = vadd.f32 1.0, %v142_v4  ;;  %v119_v28 = vmul.f32 %v255_v14, %v265_v27 }
  0x2b   :  { %v145_v29 = vand.u32 2147483647, %v271_v49  ;;  %v67_v30 = vstv %s275_s2  ;;  %v120_v38 = vsub.f32 %v116_v56, %v118_v9  ;;  %v109_v27 = vstv %s283_s4 }
  0x2c   :  { %v135_v35 = vmul.f32 %v176_v44, %v134_v19  ;;  %vm137_vm4 = vcmp.lt.f32.partialorder %v136_v20, 0.0004427343  ;;  %v144_v39 = vmul.f32 %v271_v49, %v143_v24  ;;  %v121_v40 = vsub.f32 %v117_v8, %v119_v28 }
  0x2d   :  { %v180_v0 = vpop.eup %179  ;;  %vm146_vm5 = vcmp.lt.f32.partialorder %v145_v29, 0.0004427343  ;;  %v151_v44 = vstv %s165_s5 }
  0x2e   :  { %v182_v5 = vpop.eup %181  ;;  %v48_v6 = vmul.f32 0.6931472, %v180_v0 }
  0x2f   :  { %v57_v10 = vmul.f32 0.6931472, %v182_v5  ;;  %v184_v16 = vpop.eup %183 }
  0x30   :  { %v54_v17 = vsel %vm279_vm0, %v51_v61, %v48_v6  ;;  %v186_v21 = vpop.eup %185  ;;  %v90_v23 = vmul.f32 0.6931472, %v184_v16 }
  0x31   :  { %v63_v13 = vsel %vm286_vm1, %v60_v2, %v57_v10  ;;  %v64_v22 = vadd.f32 %v54_v17, %v36_v42  ;;  %v99_v26 = vmul.f32 0.6931472, %v186_v21  ;;  %v188_v36 = vpop.eup %187 }
  0x32   :  { %v65_v25 = vadd.f32 %v63_v13, %v37_v45  ;;  %v96_v31 = vsel %vm292_vm2, %v93_v11, %v90_v23  ;;  %v190_v14 = vpop.eup %189  ;;  %v132_v41 = vmul.f32 0.6931472, %v188_v36 }
  0x33   :  { %v105_v33 = vsel %vm296_vm3, %v102_v18, %v99_v26  ;;  %v106_v34 = vadd.f32 %v96_v31, %v78_v55  ;;  %v141_v43 = vmul.f32 0.6931472, %v190_v14 }
  0x34   :  { %v66_v32 = vadd.f32 %v65_v25, %v64_v22  ;;  %v107_v37 = vadd.f32 %v105_v33, %v79_v3  ;;  %v138_v46 = vsel %vm137_vm4, %v135_v35, %v132_v41 }
  0x35   :  { %v147_v48 = vsel %vm146_vm5, %v144_v39, %v141_v43  ;;  %v148_v50 = vadd.f32 %v138_v46, %v120_v38 }
  0x36   :  { %v108_v42 = vadd.f32 %v107_v37, %v106_v34  ;;  %v68_v45 = vmul.f32 %v67_v30, %v66_v32  ;;  %v149_v51 = vadd.f32 %v147_v48, %v121_v40 }
  0x38   :  { %v110_v47 = vmul.f32 %v109_v27, %v108_v42  ;;  %v150_v53 = vadd.f32 %v149_v51, %v148_v50 }
  0x3a   :  { %v111_v52 = vadd.f32 %v110_v47, %v68_v45  ;;  %v152_v54 = vmul.f32 %v151_v44, %v150_v53 }
  0x3c   :  { %v153_v55 = vadd.f32 %v152_v54, %v111_v52 }
  0x3e   :  { %154 = vst [vmem:[%s320_s3] sm:$0xff] %v153_v55 }
  0x3f   :  { %159 = vsyncpa [#allocation3], 1 }

</bundles_post_ra>
